<compile_context>
chip_gen: v5e
topology: v5e:2x2
jax: 0.10.0
libtpu: 0.0.40
codegen_flags: <defaults>
</compile_context>

<pallas_src>
import math

import numpy as np
import jax
import jax.numpy as jnp
from jax.experimental import pallas as pl
from jax.experimental.pallas import tpu as pltpu

_SQRT_2_OVER_PI = 0.7978845608028654  # math.sqrt(2.0 / math.pi)
_COEFF = 0.044715


def _gelu_kernel(x_ref, o_ref):
    # Pure elementwise tile: mul/add on the VPU, tanh on the EUP.
    x = x_ref[...].astype(jnp.float32)
    inner = _SQRT_2_OVER_PI * (x + _COEFF * (x * x * x))
    o_ref[...] = (0.5 * x * (1.0 + jnp.tanh(inner))).astype(o_ref.dtype)


def _run_gelu_2d(x2d, *, target_block_bytes=2 * 1024 * 1024):
    """Tiled, pipelined GELU over a 2-D (rows, lanes) array."""
    rows, lanes = x2d.shape
    dtype = x2d.dtype
    itemsize = jnp.dtype(dtype).itemsize
    # dtype-dependent sublane multiple: 8 for f32, 16 for bf16/f16, 32 for i8/fp8.
    sublane = max(8, 32 // itemsize)

    if rows <= sublane:
        # Full-extent row block (allowed regardless of divisibility).
        block_rows = rows
    else:
        bytes_per_row = lanes * itemsize
        # ~2 MiB per buffer, rounded down to the sublane multiple.
        br = max(sublane, (target_block_bytes // bytes_per_row) // sublane * sublane)
        # Keep >= ~4 grid steps so v7x megacore sharding + DMA/compute overlap
        # have work to distribute even on mid-sized tensors.
        quarter = -(-rows // 4)
        quarter = -(-quarter // sublane) * sublane
        block_rows = min(br, quarter)

    grid = (pl.cdiv(rows, block_rows),)
    n = rows * lanes
    cost = pl.CostEstimate(
        flops=8 * n, transcendentals=n, bytes_accessed=2 * n * itemsize)

    return pl.pallas_call(
        _gelu_kernel,
        out_shape=jax.ShapeDtypeStruct((rows, lanes), dtype),
        grid=grid,
        in_specs=[pl.BlockSpec((block_rows, lanes), lambda i: (i, 0))],
        out_specs=pl.BlockSpec((block_rows, lanes), lambda i: (i, 0)),
        compiler_params=pltpu.CompilerParams(
            dimension_semantics=("parallel",),
            vmem_limit_bytes=32 * 1024 * 1024),
        cost_estimate=cost,
    )(x2d)


def gelu_forward(x):
    """GELU over an arbitrarily shaped array, forwarding to the Pallas kernel."""
    orig_shape = x.shape
    dtype = x.dtype
    n = math.prod(orig_shape) if orig_shape else 1
    if n == 0:
        return x

    itemsize = jnp.dtype(dtype).itemsize
    sublane = max(8, 32 // itemsize)

    # --- Path A: lane-dense, zero-copy (free bitcast reshape). ---
    lanes = None
    for cand in (1024, 512, 256, 128):
        if n % cand == 0:
            lanes = cand
            break
    if lanes is not None:
        out2d = _run_gelu_2d(x.reshape(n // lanes, lanes))
        return out2d.reshape(orig_shape)

    # --- Path B: keep the trailing dim as the (full-extent) lane dim. ---
    last = orig_shape[-1] if orig_shape else 1
    rows = n // last
    min_block_rows = min(rows, sublane) if rows > 0 else 1
    min_block_bytes = max(1, min_block_rows) * last * itemsize
    if min_block_bytes <= 8 * 1024 * 1024:
        out2d = _run_gelu_2d(x.reshape(rows, last))
        return out2d.reshape(orig_shape)

    # --- Path C (rare): huge ragged shapes that neither zero-copy layout can
    # express.  Pad to a lane multiple, run the kernel, slice back.  Costs extra
    # HBM passes but is correctness-only fallback.
    lanes = 512
    rows = pl.cdiv(n, lanes)
    flat = jnp.pad(jnp.ravel(x), (0, rows * lanes - n))
    out2d = _run_gelu_2d(flat.reshape(rows, lanes))
    return out2d.reshape(-1)[:n].reshape(orig_shape)


def ref_gelu(x):
    """Numpy reference with identical (tanh-approximation) semantics."""
    x = np.asarray(x, dtype=np.float64)
    return 0.5 * x * (1.0 + np.tanh(_SQRT_2_OVER_PI * (x + _COEFF * np.power(x, 3))))


if __name__ == "__main__":
    key = jax.random.PRNGKey(0)

    # Small shape consistent with a generic activation-module input (Path A).
    x = jax.random.normal(key, (2, 4, 16, 16), dtype=jnp.float32) * 3.0
    out = jax.block_until_ready(gelu_forward(x))
    np.testing.assert_allclose(np.asarray(out), ref_gelu(np.asarray(x)),
                               rtol=1e-5, atol=1e-5)

    # Non-128-multiple element count exercises the zero-copy ragged path (B).
    x2 = jax.random.normal(jax.random.PRNGKey(1), (3, 7, 129), dtype=jnp.float32)
    out2 = jax.block_until_ready(gelu_forward(x2))
    np.testing.assert_allclose(np.asarray(out2), ref_gelu(np.asarray(x2)),
                               rtol=1e-5, atol=1e-5)

    # bf16 input exercises the dtype-aware sublane rounding.
    x3 = jax.random.normal(jax.random.PRNGKey(2), (4, 8, 256), dtype=jnp.bfloat16)
    out3 = jax.block_until_ready(gelu_forward(x3))
    np.testing.assert_allclose(np.asarray(out3.astype(jnp.float32)),
                               ref_gelu(np.asarray(x3.astype(jnp.float32))),
                               rtol=2e-2, atol=2e-2)

    print("KERNEL_OK")
</pallas_src>

<mosaic_0001>
module attributes {stable_mosaic.version = 11 : i64} {
  func.func @_gelu_kernel(%arg0: i32, %arg1: memref<2x1024xf32, #tpu.memory_space<vmem>>, %arg2: memref<2x1024xf32, #tpu.memory_space<vmem>>) attributes {dimension_semantics = [#tpu.dimension_semantics<parallel>], iteration_bounds = array<i64: 1>, scalar_prefetch = 0 : i64, scratch_operands = 0 : i64, tpu.core_type = #tpu.core_type<tc>, window_params = [{transform_indices = @transform_0, window_bounds = array<i64: 2, 1024>}, {transform_indices = @transform_1, window_bounds = array<i64: 2, 1024>}]} {
    %c0 = arith.constant 0 : index
    %c0_0 = arith.constant 0 : index
    %0 = vector.load %arg1[%c0, %c0_0] : memref<2x1024xf32, #tpu.memory_space<vmem>>, vector<2x1024xf32>
    %1 = arith.mulf %0, %0 : vector<2x1024xf32>
    %2 = arith.mulf %1, %0 : vector<2x1024xf32>
    %cst = arith.constant 4.471500e-02 : f32
    %3 = vector.broadcast %cst : f32 to vector<2x1024xf32>
    %4 = arith.mulf %3, %2 : vector<2x1024xf32>
    %5 = arith.addf %0, %4 : vector<2x1024xf32>
    %cst_1 = arith.constant 0.797884583 : f32
    %6 = vector.broadcast %cst_1 : f32 to vector<2x1024xf32>
    %7 = arith.mulf %6, %5 : vector<2x1024xf32>
    %cst_2 = arith.constant 5.000000e-01 : f32
    %8 = vector.broadcast %cst_2 : f32 to vector<2x1024xf32>
    %9 = arith.mulf %8, %0 : vector<2x1024xf32>
    %10 = math.tanh %7 : vector<2x1024xf32>
    %cst_3 = arith.constant 1.000000e+00 : f32
    %11 = vector.broadcast %cst_3 : f32 to vector<2x1024xf32>
    %12 = arith.addf %11, %10 : vector<2x1024xf32>
    %13 = arith.mulf %9, %12 : vector<2x1024xf32>
    %c0_4 = arith.constant 0 : index
    %c0_5 = arith.constant 0 : index
    %14 = vector.load %arg2[%c0_4, %c0_5] : memref<2x1024xf32, #tpu.memory_space<vmem>>, vector<2x1024xf32>
    tpu.vector_store %arg2[%c0_4, %c0_5], %13 {strides = array<i32>} : memref<2x1024xf32, #tpu.memory_space<vmem>>, vector<2x1024xf32>,
    return
  }
  func.func @transform_0(%arg0: i32) -> (i32, i32) {
    %c0_i32 = arith.constant 0 : i32
    %c0_i32_0 = arith.constant 0 : i32
    return %arg0, %c0_i32 : i32, i32
  }
  func.func @transform_1(%arg0: i32) -> (i32, i32) {
    %c0_i32 = arith.constant 0 : i32
    %c0_i32_0 = arith.constant 0 : i32
    return %arg0, %c0_i32 : i32, i32
  }
}

</mosaic_0001>

<bundles_post_ra>
// kernel: tpu_custom_call.1
= control target key start
LH: loop header
LB: loop body
LE: loop exit
PB: predicated region body
PF: predicated region fallthrough
CT: control target
= control target key end

     0   :  { %6 = vsyncpa [#allocation3], 0  ;;  %s138_s0 = inlined_call_operand.hbm [shape: f32[2,1024], index: 0, kind: input, shape index: {}]   ;;  %s139_s1 = inlined_call_operand.hbm [shape: f32[2,1024], index: 1, kind: output, shape index: {}]  }
   0x1   :  { %7 = vsyncpa [#allocation4], 0  ;;  %s13_s8 = sshll.u32 %s138_s0, 4  ;;  %s120_s9 = smov [#allocation2]   ;;  %s14_s8 = int_to_ptr.hbm [resolvable:$true] %s13_s8 }
   0x2   :  { %s15_s10 = sshll.u32 %s120_s9, 4  ;;  %s16_s10 = int_to_ptr.vmem [resolvable:$true] %s15_s10 }
   0x3   :  { %18 = dma.hbm_to_vmem [thread:$0]  %s14_s8, 256, %s16_s10, [#allocation3]  }
   0x4   :  { %116 = dma.done.wait [#allocation3], 256  }
   0x5   :  { %117 = vsyncadd [#allocation3], 4294967040  ;;  %v23_v0 = vld [vmem:[#allocation2] sm:$0xff]  ;;  %v24_v1 = vld [vmem:[#allocation2 + $0x8] sm:$0xff]  ;;  %s121_s0 = smov [#allocation5]   ;;  %s52_s14 = sshll.u32 %s139_s1, 4  ;;  %s53_s14 = int_to_ptr.hbm [resolvable:$true] %s52_s14 }
   0x6   :  { %v25_v2 = vmul.f32 %v23_v0, %v23_v0  ;;  %v26_v3 = vmul.f32 %v24_v1, %v24_v1  ;;  %v35_v12 = vmul.f32 0.5, %v23_v0  ;;  %v36_v14 = vmul.f32 0.5, %v24_v1  ;;  %s50_s11 = sshll.u32 %s121_s0, 4  ;;  %s51_s11 = int_to_ptr.vmem [resolvable:$true] %s50_s11 }
   0x8   :  { %v27_v4 = vmul.f32 %v25_v2, %v23_v0  ;;  %v28_v5 = vmul.f32 %v26_v3, %v24_v1 }
   0xa   :  { %v29_v6 = vmul.f32 0.044715, %v27_v4  ;;  %v30_v7 = vmul.f32 0.044715, %v28_v5 }
   0xc   :  { %v31_v8 = vadd.f32 %v29_v6, %v23_v0  ;;  %v32_v9 = vadd.f32 %v30_v7, %v24_v1 }
   0xe   :  { %v33_v10 = vmul.f32 0.7978846, %v31_v8  ;;  %v34_v11 = vmul.f32 0.7978846, %v32_v9 }
  0x10   :  { %64 = vtanh.f32 %v33_v10 }
  0x11   :  { %66 = vtanh.f32 %v34_v11 }
  0x16   :  { %v65_v13 = vpop.eup %64 }
  0x17   :  { %v67_v15 = vpop.eup %66  ;;  %v39_v16 = vadd.f32 1.0, %v65_v13 }
  0x18   :  { %v40_v17 = vadd.f32 1.0, %v67_v15 }
  0x19   :  { %v41_v18 = vmul.f32 %v39_v16, %v35_v12 }
  0x1a   :  { %v42_v19 = vmul.f32 %v40_v17, %v36_v14 }
  0x1b   :  { %43 = vst [vmem:[#allocation5] sm:$0xff] %v41_v18 }
  0x1c   :  { %44 = vst [vmem:[#allocation5 + $0x8] sm:$0xff] %v42_v19 }
  0x1d   :  { %55 = dma.vmem_to_hbm [thread:$0]  %s51_s11, 256, %s53_s14, [#allocation4]  }
  0x1e   :  { %118 = dma.done.wait [#allocation4], 256  }
  0x1f   :  { %119 = vsyncadd [#allocation4], 4294967040 }
  0x20   :  { %60 = vsyncpa [#allocation3], 1 }
  0x21   :  { %61 = vsyncpa [#allocation4], 1 }

</bundles_post_ra>
